<compile_context>
chip_gen: v7x
topology: tpu7x:2x2x1
jax: 0.10.0
libtpu: 0.0.40
codegen_flags: <defaults>
</compile_context>

<pallas_src>
from typing import NamedTuple

import jax
import jax.numpy as jnp
from jax.experimental import pallas as pl
from jax.experimental.pallas import tpu as pltpu


# --------------------------------------------------------------------------- #
# Kernels
# --------------------------------------------------------------------------- #
def ffn_resident_kernel(x_ref, w1_ref, b1_ref, w2_ref, b2_ref, o_ref):
    """Weights fully resident in VMEM; grid is (row_tiles,)."""
    h = jnp.dot(x_ref[...], w1_ref[...], preferred_element_type=jnp.float32)
    h = jnp.maximum(h + b1_ref[...], 0.0)                  # bias + ReLU in f32
    y = jnp.dot(h.astype(w2_ref.dtype), w2_ref[...],
                preferred_element_type=jnp.float32)
    o_ref[...] = (y + b2_ref[...]).astype(o_ref.dtype)


def ffn_streamed_kernel(x_ref, w1_ref, b1_ref, w2_ref, b2_ref, o_ref, acc_ref):
    """Hidden dim streamed on grid axis 1; f32 accumulator in VMEM scratch."""
    k = pl.program_id(1)

    h = jnp.dot(x_ref[...], w1_ref[...], preferred_element_type=jnp.float32)
    h = jnp.maximum(h + b1_ref[...], 0.0)
    part = jnp.dot(h.astype(w2_ref.dtype), w2_ref[...],
                   preferred_element_type=jnp.float32)

    @pl.when(k == 0)
    def _():
        acc_ref[...] = part                 # no broadcast init / no RMW at k==0

    @pl.when(k > 0)
    def _():
        acc_ref[...] += part

    @pl.when(k == pl.num_programs(1) - 1)
    def _():
        # b2 folded into the finalize instead of the accumulator init.
        o_ref[...] = (acc_ref[...] + b2_ref[...]).astype(o_ref.dtype)


# --------------------------------------------------------------------------- #
# Planning helpers
# --------------------------------------------------------------------------- #
def _round_up(a, m):
    return ((a + m - 1) // m) * m


def _default_vmem_budget():
    """~3/4 of physical VMEM: ~96 MiB on v5e/v6e, ~48 MiB on v7x."""
    try:
        cap = int(pltpu.get_tpu_info().vmem_capacity_bytes)
    except Exception:
        cap = 64 * 1024 * 1024            # v7x floor: safe on every generation
    budget = (cap * 3) // 4
    return max(min(budget, 100 * 1024 * 1024), 32 * 1024 * 1024)


def _plan_tiles(M, Ep, Hp, cdt_size, out_size, budget):
    """Pick mode (resident vs streamed weights) and tile sizes for this shape."""
    Mp8 = _round_up(max(M, 1), 8)

    def act_bytes(tm):
        # double-buffered x block + double-buffered out block
        return 2 * tm * Ep * cdt_size + 2 * tm * Ep * out_size

    # ----- Path A: weights fully resident (fetched from HBM once) -----------
    w_resident = 2 * 2 * Ep * Hp * cdt_size + 2 * (Hp + Ep) * 4
    row_cands = {min(c, Mp8) for c in (1024, 512, 256, 128)}
    row_cands.add(min(Mp8, 1024))
    row_cands = sorted(c for c in row_cands if c >= 8)

    best = None
    for tm in row_cands:
        if w_resident + act_bytes(tm) > budget:
            continue
        Mp = _round_up(Mp8, tm)
        key = (Mp, -tm)                    # least row padding, then largest tile
        if best is None or key < best[0]:
            best = (key, tm, Mp)
    if best is not None:
        tm, Mp = best[1], best[2]
        # v7x Megacore: keep >= 2 row tiles on the "parallel" axis when there is
        # enough work (harmless on 1-TC chips: resident blocks aren't re-fetched).
        if Mp // tm < 2 and Mp8 >= 16:
            tm = _round_up(max(tm // 2, 8), 8)
            Mp = _round_up(Mp8, tm)
        return {"mode": "resident", "tm": tm, "Mp": Mp, "th": Hp}

    # ----- Path B: stream the hidden dim (AI ~ tm FLOPs / weight byte) ------
    w_stream_once = 2 * Ep * Hp * cdt_size          # W1 + W2, one full pass
    th_cands = [t for t in (1024, 512, 256, 128) if Hp % t == 0]
    best = None
    for cand in (1024, 512, 256, 128):
        tm = min(cand, Mp8)
        Mp = _round_up(Mp8, tm)
        ntiles = Mp // tm
        for th in th_cands:
            blocks = (2 * (Ep * th + th * Ep) * cdt_size   # W1/W2 tiles (2 bufs)
                      + 2 * th * 4 + 2 * Ep * 4            # b1 tile, b2
                      + act_bytes(tm)
                      + tm * Ep * 4)                       # f32 accumulator
            if blocks > budget:
                continue
            # Roofline-ish proxy to trade row padding vs weight re-streaming.
            hbm = ntiles * w_stream_once + Mp * Ep * (cdt_size + out_size)
            flops = 4 * Mp * Ep * Hp
            key = (max(float(hbm), flops / 400.0), -tm, -th)
            if best is None or key < best[0]:
                best = (key, tm, Mp, th)
    if best is None:                                        # last resort
        return {"mode": "streamed", "tm": 8, "Mp": _round_up(Mp8, 8), "th": 128}
    return {"mode": "streamed", "tm": best[1], "Mp": best[2], "th": best[3]}


# --------------------------------------------------------------------------- #
# Parameter prep (hoisted out of the per-call path) and wrapper
# --------------------------------------------------------------------------- #
class FFNParams(NamedTuple):
    w1: jax.Array   # (Ep, Hp)  compute dtype
    b1: jax.Array   # (1, Hp)   f32
    w2: jax.Array   # (Hp, Ep)  compute dtype
    b2: jax.Array   # (1, Ep)   f32


def prepare_ffn_params(w1, b1, w2, b2, compute_dtype=jnp.bfloat16):
    """Pad to lane-dense (multiples of 128) shapes and cast once, not per call."""
    E, H = w1.shape
    Ep, Hp = _round_up(E, 128), _round_up(H, 128)
    w1p = jnp.pad(w1, ((0, Ep - E), (0, Hp - H))).astype(compute_dtype)
    w2p = jnp.pad(w2, ((0, Hp - H), (0, Ep - E))).astype(compute_dtype)
    b1p = jnp.pad(b1, (0, Hp - H)).reshape(1, Hp).astype(jnp.float32)
    b2p = jnp.pad(b2, (0, Ep - E)).reshape(1, Ep).astype(jnp.float32)
    return FFNParams(w1p, b1p, w2p, b2p)


def feed_forward(x, params: FFNParams, *, vmem_budget_bytes=None):
    """x: (B, T, E) -> (B, T, E). Fused Linear-ReLU-Linear (+identity dropout)."""
    w1p, b1p, w2p, b2p = params
    B, T, E = x.shape
    M = B * T
    Ep, Hp = w1p.shape
    cdt = w1p.dtype
    out_dtype = x.dtype
    cdt_size = jnp.dtype(cdt).itemsize
    out_size = jnp.dtype(out_dtype).itemsize

    if vmem_budget_bytes is None:
        vmem_budget_bytes = _default_vmem_budget()
    plan_budget = max(int(vmem_budget_bytes) - (2 << 20), 4 << 20)  # small slack

    plan = _plan_tiles(M, Ep, Hp, cdt_size, out_size, plan_budget)
    tm, Mp, th = plan["tm"], plan["Mp"], plan["th"]
    n_row = Mp // tm

    # Pad/cast activations only when actually needed.
    x2d = x.reshape(M, E)
    if (Mp != M) or (Ep != E):
        x2d = jnp.pad(x2d, ((0, Mp - M), (0, Ep - E)))
    if x2d.dtype != cdt:
        x2d = x2d.astype(cdt)

    w_bytes = (w1p.size + w2p.size) * cdt_size
    io_bytes = (x2d.size * cdt_size + Mp * Ep * out_size
                + (b1p.size + b2p.size) * 4)

    if plan["mode"] == "resident":
        grid_spec = pltpu.PrefetchScalarGridSpec(
            num_scalar_prefetch=0,
            grid=(n_row,),
            in_specs=[
                pl.BlockSpec((tm, Ep), lambda i: (i, 0)),   # x rows
                pl.BlockSpec((Ep, Hp), lambda i: (0, 0)),   # W1 (resident)
                pl.BlockSpec((1, Hp), lambda i: (0, 0)),    # b1 (resident)
                pl.BlockSpec((Hp, Ep), lambda i: (0, 0)),   # W2 (resident)
                pl.BlockSpec((1, Ep), lambda i: (0, 0)),    # b2 (resident)
            ],
            out_specs=pl.BlockSpec((tm, Ep), lambda i: (i, 0)),
        )
        kernel = ffn_resident_kernel
        dim_sem = ("parallel",)
        bytes_accessed = w_bytes + io_bytes
    else:
        n_hid = Hp // th
        grid_spec = pltpu.PrefetchScalarGridSpec(
            num_scalar_prefetch=0,
            grid=(n_row, n_hid),
            in_specs=[
                pl.BlockSpec((tm, Ep), lambda i, k: (i, 0)),   # x rows
                pl.BlockSpec((Ep, th), lambda i, k: (0, k)),   # W1 hidden tile
                pl.BlockSpec((1, th), lambda i, k: (0, k)),    # b1 hidden tile
                pl.BlockSpec((th, Ep), lambda i, k: (k, 0)),   # W2 hidden tile
                pl.BlockSpec((1, Ep), lambda i, k: (0, 0)),    # b2 (constant)
            ],
            out_specs=pl.BlockSpec((tm, Ep), lambda i, k: (i, 0)),
            scratch_shapes=[pltpu.VMEM((tm, Ep), jnp.float32)],
        )
        kernel = ffn_streamed_kernel
        dim_sem = ("parallel", "arbitrary")
        # Weights are re-streamed once per row tile in this mode.
        bytes_accessed = n_row * w_bytes + io_bytes

    cost = pl.CostEstimate(
        flops=4 * Mp * Ep * Hp,            # two matmuls, 2*M*E*H each
        transcendentals=0,
        bytes_accessed=int(bytes_accessed),
    )

    out2d = pl.pallas_call(
        kernel,
        out_shape=jax.ShapeDtypeStruct((Mp, Ep), out_dtype),
        grid_spec=grid_spec,
        compiler_params=pltpu.CompilerParams(
            dimension_semantics=dim_sem,
            vmem_limit_bytes=int(vmem_budget_bytes),
        ),
        cost_estimate=cost,
    )(x2d, w1p, b1p, w2p, b2p)

    return out2d[:M, :E].reshape(B, T, E)


# --------------------------------------------------------------------------- #
# Init + self-test
# --------------------------------------------------------------------------- #
def init_params(key, embedding_dim):
    """nn.Linear-style uniform(-1/sqrt(fan_in), 1/sqrt(fan_in)) init.
    Weights stored as (in_features, out_features) for the x @ W convention."""
    E = embedding_dim
    H = 4 * E
    k1, k2, k3, k4 = jax.random.split(key, 4)
    bound1 = 1.0 / jnp.sqrt(E)
    bound2 = 1.0 / jnp.sqrt(H)
    w1 = jax.random.uniform(k1, (E, H), jnp.float32, -bound1, bound1)
    b1 = jax.random.uniform(k2, (H,), jnp.float32, -bound1, bound1)
    w2 = jax.random.uniform(k3, (H, E), jnp.float32, -bound2, bound2)
    b2 = jax.random.uniform(k4, (E,), jnp.float32, -bound2, bound2)
    return w1, b1, w2, b2


if __name__ == "__main__":
    key = jax.random.PRNGKey(0)
    kx, kp = jax.random.split(key)

    B, T, E = 2, 8, 32                 # batch=2, seq=8, embedding_dim=32 (hidden=128)
    x = jax.random.normal(kx, (B, T, E), dtype=jnp.float32)
    w1, b1, w2, b2 = init_params(kp, E)

    # Plain JAX reference (dropout is identity in eval mode).
    ref = (jnp.maximum(x.reshape(-1, E) @ w1 + b1, 0.0) @ w2 + b2).reshape(B, T, E)

    # f32 compute path.
    params_f32 = prepare_ffn_params(w1, b1, w2, b2, compute_dtype=jnp.float32)
    out_f32 = jax.block_until_ready(feed_forward(x, params_f32))
    assert out_f32.shape == (B, T, E)
    assert jnp.allclose(out_f32, ref, atol=1e-4, rtol=1e-4)

    # Default bf16 MXU path (f32 accumulation): loose tolerance for bf16 inputs.
    params_bf16 = prepare_ffn_params(w1, b1, w2, b2, compute_dtype=jnp.bfloat16)
    out_bf16 = jax.block_until_ready(feed_forward(x, params_bf16))
    assert out_bf16.shape == (B, T, E)
    assert jnp.allclose(out_bf16, ref, atol=2e-2, rtol=2e-2)

    print("KERNEL_OK")
</pallas_src>

<mosaic_0001>
module attributes {stable_mosaic.version = 11 : i64} {
  func.func @ffn_resident_kernel(%arg0: i32, %arg1: memref<8x128xf32, #tpu.memory_space<vmem>>, %arg2: memref<128x128xf32, #tpu.memory_space<vmem>>, %arg3: memref<1x128xf32, #tpu.memory_space<vmem>>, %arg4: memref<128x128xf32, #tpu.memory_space<vmem>>, %arg5: memref<1x128xf32, #tpu.memory_space<vmem>>, %arg6: memref<8x128xf32, #tpu.memory_space<vmem>>) attributes {dimension_semantics = [#tpu.dimension_semantics<parallel>], iteration_bounds = array<i64: 2>, scalar_prefetch = 0 : i64, scratch_operands = 0 : i64, tpu.core_type = #tpu.core_type<tc>, window_params = [{transform_indices = @transform_0, window_bounds = array<i64: 8, 128>}, {pipeline_mode = #tpu.pipeline_mode<synchronous>, transform_indices = @transform_1, window_bounds = array<i64: 128, 128>}, {pipeline_mode = #tpu.pipeline_mode<synchronous>, transform_indices = @transform_2, window_bounds = array<i64: 1, 128>}, {pipeline_mode = #tpu.pipeline_mode<synchronous>, transform_indices = @transform_3, window_bounds = array<i64: 128, 128>}, {pipeline_mode = #tpu.pipeline_mode<synchronous>, transform_indices = @transform_4, window_bounds = array<i64: 1, 128>}, {transform_indices = @transform_5, window_bounds = array<i64: 8, 128>}]} {
    %c0 = arith.constant 0 : index
    %c0_0 = arith.constant 0 : index
    %0 = vector.load %arg1[%c0, %c0_0] : memref<8x128xf32, #tpu.memory_space<vmem>>, vector<8x128xf32>
    %c0_1 = arith.constant 0 : index
    %c0_2 = arith.constant 0 : index
    %1 = vector.load %arg2[%c0_1, %c0_2] : memref<128x128xf32, #tpu.memory_space<vmem>>, vector<128x128xf32>
    %cst = arith.constant dense<0.000000e+00> : vector<8x128xf32>
    %2 = tpu.matmul %0, %1, %cst {dimension_numbers = #tpu.dot_dimension_numbers<[1], [0], [0], [1], [0, 0, 1, 1], [], []>} : vector<8x128xf32>, vector<128x128xf32>, vector<8x128xf32> -> vector<8x128xf32>
    %c0_3 = arith.constant 0 : index
    %c0_4 = arith.constant 0 : index
    %3 = vector.load %arg3[%c0_3, %c0_4] : memref<1x128xf32, #tpu.memory_space<vmem>>, vector<1x128xf32>
    %4 = vector.broadcast %3 : vector<1x128xf32> to vector<8x128xf32>
    %5 = arith.addf %2, %4 : vector<8x128xf32>
    %cst_5 = arith.constant 0.000000e+00 : f32
    %6 = vector.broadcast %cst_5 : f32 to vector<8x128xf32>
    %7 = arith.maximumf %5, %6 : vector<8x128xf32>
    %c0_6 = arith.constant 0 : index
    %c0_7 = arith.constant 0 : index
    %8 = vector.load %arg4[%c0_6, %c0_7] : memref<128x128xf32, #tpu.memory_space<vmem>>, vector<128x128xf32>
    %cst_8 = arith.constant dense<0.000000e+00> : vector<8x128xf32>
    %9 = tpu.matmul %7, %8, %cst_8 {dimension_numbers = #tpu.dot_dimension_numbers<[1], [0], [0], [1], [0, 0, 1, 1], [], []>} : vector<8x128xf32>, vector<128x128xf32>, vector<8x128xf32> -> vector<8x128xf32>
    %c0_9 = arith.constant 0 : index
    %c0_10 = arith.constant 0 : index
    %10 = vector.load %arg5[%c0_9, %c0_10] : memref<1x128xf32, #tpu.memory_space<vmem>>, vector<1x128xf32>
    %11 = vector.broadcast %10 : vector<1x128xf32> to vector<8x128xf32>
    %12 = arith.addf %9, %11 : vector<8x128xf32>
    %c0_11 = arith.constant 0 : index
    %c0_12 = arith.constant 0 : index
    %13 = vector.load %arg6[%c0_11, %c0_12] : memref<8x128xf32, #tpu.memory_space<vmem>>, vector<8x128xf32>
    tpu.vector_store %arg6[%c0_11, %c0_12], %12 {strides = array<i32>} : memref<8x128xf32, #tpu.memory_space<vmem>>, vector<8x128xf32>,
    return
  }
  func.func @transform_0(%arg0: i32) -> (i32, i32) {
    %c0_i32 = arith.constant 0 : i32
    %c0_i32_0 = arith.constant 0 : i32
    return %arg0, %c0_i32 : i32, i32
  }
  func.func @transform_1(%arg0: i32) -> (i32, i32) {
    %c0_i32 = arith.constant 0 : i32
    %c0_i32_0 = arith.constant 0 : i32
    %c0_i32_1 = arith.constant 0 : i32
    return %c0_i32, %c0_i32_0 : i32, i32
  }
  func.func @transform_2(%arg0: i32) -> (i32, i32) {
    %c0_i32 = arith.constant 0 : i32
    %c0_i32_0 = arith.constant 0 : i32
    %c0_i32_1 = arith.constant 0 : i32
    return %c0_i32, %c0_i32_0 : i32, i32
  }
  func.func @transform_3(%arg0: i32) -> (i32, i32) {
    %c0_i32 = arith.constant 0 : i32
    %c0_i32_0 = arith.constant 0 : i32
    %c0_i32_1 = arith.constant 0 : i32
    return %c0_i32, %c0_i32_0 : i32, i32
  }
  func.func @transform_4(%arg0: i32) -> (i32, i32) {
    %c0_i32 = arith.constant 0 : i32
    %c0_i32_0 = arith.constant 0 : i32
    %c0_i32_1 = arith.constant 0 : i32
    return %c0_i32, %c0_i32_0 : i32, i32
  }
  func.func @transform_5(%arg0: i32) -> (i32, i32) {
    %c0_i32 = arith.constant 0 : i32
    %c0_i32_0 = arith.constant 0 : i32
    return %arg0, %c0_i32 : i32, i32
  }
}

</mosaic_0001>

<bundles_post_ra>
// kernel: tpu_custom_call.1
= control target key start
LH: loop header
LB: loop body
LE: loop exit
PB: predicated region body
PF: predicated region fallthrough
CT: control target
= control target key end

     0   :  { %10 = vsyncpa [#allocation3], 0  ;;  %s1258_s0 = inlined_call_operand.hbm [shape: f32[16,128], index: 0, kind: input, shape index: {}]   ;;  %s1259_s1 = inlined_call_operand.hbm [shape: f32[128,128], index: 1, kind: input, shape index: {}]   ;;  %s1260_s2 = inlined_call_operand.vmem [shape: f32[1,128], index: 2, kind: input, shape index: {}]   ;;  %s1261_s3 = inlined_call_operand.hbm [shape: f32[128,128], index: 3, kind: input, shape index: {}]   ;;  %s1262_s4 = inlined_call_operand.vmem [shape: f32[1,128], index: 4, kind: input, shape index: {}]   ;;  %s1263_s5 = inlined_call_operand.hbm [shape: f32[16,128], index: 5, kind: output, shape index: {}]  }
   0x1   :  { %12 = vsyncpa [#allocation3 + $0x1], 0 }
   0x2   :  { %13 = vsyncpa [#allocation6], 0 }
   0x3   :  { %14 = vsyncpa [#allocation4], 0 }
   0x4   :  { %16 = vsyncpa [#allocation4 + $0x1], 0  ;;  %s1000_s18 = smov 0   ;;  %s1002_s19 = smov 0  }
   0x5   :  { %s1004_s20 = smov 0   ;;  %s1006_s21 = smov 0  }
   0x6 LB: > { %s1021_s22 = sadd.s32 4294967295, %s959_s21   ;;  %s561_s23 = sadd.s32 4294967294, %s959_s21   ;;  %s959_s21 = sphi %s1006_s21, %s1283_s21   ;;  %s955_s20 = sphi %s1004_s20, %s1282_s20   ;;  %s951_s19 = sphi %s1002_s19, %s1281_s19   ;;  %s947_s18 = sphi %s1000_s18, %s1280_s18  }
   0x7   : > { %p42_p0 = scmp.ne.s32.totalorder %s951_s19, %s947_s18  ;;  %p1264_p1 = scmp.eq.s32.totalorder %s1021_s22, 0 }
   0x8   : > { %p156_p3 = scmp.eq.s32.totalorder %s561_s23, 1  ;;  %p562_p5 = scmp.ge.s32.totalorder %s959_s21, 1 }
   0x9   : > { %p1030_p4 = por %p1264_p1, %p42_p0  ;;  %p163_p7 = scmp.lt.s32.totalorder %s959_s21, 3 }
   0xa   : > { %p1035_p6 = por %p156_p3, %p42_p0  ;;  %s961_s27 = smov [#allocation5]  }
   0xb   : > { %s1267_s24 = scalar_select %p1030_p4, 1, 0 }
   0xc   : > { %s1268_s25 = scalar_select %p1035_p6, 1, 0 }
   0xd   : > { %p1040_p8 = pnand %p562_p5, %p163_p7  ;;  %s175_s28 = sshll.u32 %s961_s27, 4  ;;  %s1044_s28 = int_to_ptr.vmem [resolvable:$true] %s175_s28 }
   0xe   : > { %s962_s30 = smov [#allocation7]   ;;  %s803_s9 = scalar_lea.hbm %s1259_s1, 2048 }
   0xf   : > { %p743_p9 = pneg %p1040_p8  ;;  %s191_s6 = sshll.u32 %s962_s30, 4  ;;  %s1055_s6 = int_to_ptr.vmem [resolvable:$true] %s191_s6 }
  0x10   : > { %p804_p12 = scmp.ne.s32.totalorder %s1259_s1, %s803_s9  ;;  %p810_p5 = scmp.lt.u32.totalorder %s803_s9, %s1259_s1 }
  0x11   : > { %p1051_p11 = pnand %p743_p9, %p1264_p1 }
  0x13   : > { %p805_p13 = pneg %p1051_p11 }
  0x15   : > { %p806_p0 = pnand %p805_p13, %p804_p12 }
  0x17   : > { %p807_p3 = pneg %p806_p0 }
  0x19   : > { %p812_p7 = pnand %p810_p5, %p807_p3 }
  0x1b   : > { %815 = shalt.err (!%p812_p7)
}
  0x1c   : > { %s816_s14 = scalar_lea.vmem %s1044_s28, 2048  ;;  %p824_p2 = scmp.lt.s32.totalorder %s1044_s28, %s1044_s28 }
  0x1d   : > { %p817_p9 = scmp.ne.s32.totalorder %s1044_s28, %s816_s14  ;;  %p825_p12 = scmp.lt.s32.totalorder %s816_s14, %s816_s14 }
  0x1f   : > { %p819_p10 = pnand %p817_p9, %p805_p13  ;;  %p826_p0 = por %p825_p12, %p824_p2 }
  0x21   : > { %p820_p1 = pneg %p819_p10 }
  0x23   : > { %p827_p6 = pnand %p826_p0, %p820_p1 }
  0x25   : > { %830 = shalt.err (!%p827_p6)
}
  0x26   : > { %s963_s15 = smov 128   ;;  %s964_s16 = smov 8  }
  0x27   : > { %746 = dma.hbm_to_vmem [thread:$0]  (!%p1051_p11), %s1259_s1, 2048, %s1044_s28, [#allocation6], %s963_s15, %s963_s15, %s964_s16  }
  0x28   : > { %s831_s7 = scalar_lea.hbm %s1261_s3, 2048 }
  0x29   : > { %p832_p2 = scmp.ne.s32.totalorder %s1261_s3, %s831_s7  ;;  %p838_p10 = scmp.lt.u32.totalorder %s831_s7, %s1261_s3 }
  0x2b   : > { %p834_p1 = pnand %p832_p2, %p805_p13 }
  0x2d   : > { %p835_p6 = pneg %p834_p1 }
  0x2f   : > { %p840_p3 = pnand %p838_p10, %p835_p6 }
  0x31   : > { %843 = shalt.err (!%p840_p3)
}
  0x32   : > { %s844_s28 = scalar_lea.vmem %s1055_s6, 2048  ;;  %p852_p12 = scmp.lt.s32.totalorder %s1055_s6, %s1055_s6 }
  0x33   : > { %p845_p5 = scmp.ne.s32.totalorder %s1055_s6, %s844_s28  ;;  %p853_p0 = scmp.lt.s32.totalorder %s844_s28, %s844_s28 }
  0x35   : > { %p847_p7 = pnand %p845_p5, %p805_p13  ;;  %p854_p2 = por %p853_p0, %p852_p12 }
  0x37   : > { %p848_p9 = pneg %p847_p7 }
  0x39   : > { %p855_p1 = pnand %p854_p2, %p848_p9 }
  0x3b   : > { %858 = shalt.err (!%p855_p1)
}
  0x3c   : > { %749 = dma.hbm_to_vmem [thread:$0]  (!%p1051_p11), %s1261_s3, 2048, %s1055_s6, [#allocation6], %s963_s15, %s963_s15, %s964_s16  }
  0x3d   : > { %s1110_s14 = sadd.s32 1, %s959_s21   ;;  %s29_s29 = sadd.s32 1, %s955_s20 }
  0x3e   : > { %s26_s17 = ssub.s32 %s959_s21, %s1110_s14  ;;  %p36_p13 = scmp.ne.s32.totalorder %s955_s20, %s951_s19 }
  0x3f   : > { %p27_p6 = scmp.eq.s32.totalorder %s26_s17, 0  ;;  %p37_p10 = scmp.eq.s32.totalorder %s959_s21, 0 }
  0x40   : > { %p1271_p3 = scmp.eq.s32.totalorder %s1021_s22, 1  ;;  %p760_p7 = scmp.lt.s32.totalorder %s959_s21, 2 }
  0x41   : > { %s1126_s27 = scalar_select %p27_p6, %s955_s20, %s29_s29  }
  0x42   : > { %p1120_p5 = por %p1271_p3, %p36_p13  ;;  %p38_p9 = por %p37_p10, %p36_p13 }
  0x43   : > { %s208_s30 = sand.u32 1, %s955_s20   ;;  %s567_s6 = sshll.u32 %s959_s21, 7 }
  0x44   : > { %s1272_s23 = scalar_select %p1120_p5, 1, 0 }
  0x45   : > { %s566_s7 = sshll.u32 %s208_s30, 3  ;;  %s1133_s8 = scalar_lea.hbm %s1258_s0, %s567_s6 }
  0x46   : > { %s212_s9 = scalar_lea.vmem [#allocation2], %s566_s7  ;;  %p1137_p11 = pnand %p760_p7, %p38_p9 }
  0x47   : > { %s219_s10 = sshll.u32 %s212_s9, 4  ;;  %s209_s28 = scalar_lea.sflag [#allocation3], %s208_s30  ;;  %s1135_s10 = int_to_ptr.vmem [resolvable:$true] %s219_s10 }
  0x48   : > { %s859_s12 = scalar_lea.hbm %s1133_s8, 128  ;;  %p861_p0 = pneg %p1137_p11 }
  0x49   : > { %p860_p12 = scmp.ne.s32.totalorder %s1133_s8, %s859_s12  ;;  %s864_s17 = scalar_lea.hbm %s1258_s0, 256 }
  0x4a   : > { %p865_p13 = scmp.lt.u32.totalorder %s1133_s8, %s1258_s0  ;;  %p866_p6 = scmp.lt.u32.totalorder %s864_s17, %s859_s12 }
  0x4b   : > { %p862_p2 = pnand %p861_p0, %p860_p12  ;;  %p868_p3 = scmp.lt.u32.totalorder %s859_s12, %s1133_s8 }
  0x4c   : > { %p867_p10 = por %p866_p6, %p865_p13 }
  0x4d   : > { %p863_p1 = pneg %p862_p2 }
  0x4e   : > { %p869_p7 = por %p868_p3, %p867_p10 }
  0x50   : > { %p870_p9 = pnand %p869_p7, %p863_p1 }
  0x52   : > { %873 = shalt.err (!%p870_p9)
}
  0x53   : > { %s874_s30 = scalar_lea.vmem %s1135_s10, 128  ;;  %s965_s15 = smov [#allocation2]  }
  0x54   : > { %p875_p12 = scmp.ne.s32.totalorder %s1135_s10, %s874_s30  ;;  %s879_s16 = sshll.u32 %s965_s15, 4  ;;  %s880_s16 = int_to_ptr.vmem [resolvable:$false] %s879_s16 }
  0x55   : > { %s881_s9 = scalar_lea.vmem %s880_s16, 256  ;;  %p882_p4 = scmp.lt.s32.totalorder %s1135_s10, %s880_s16 }
  0x56   : > { %p877_p2 = pnand %p875_p12, %p861_p0  ;;  %p883_p13 = scmp.lt.s32.totalorder %s881_s9, %s874_s30 }
  0x58   : > { %p878_p5 = pneg %p877_p2  ;;  %p884_p6 = por %p883_p13, %p882_p4 }
  0x5a   : > { %p885_p10 = pnand %p884_p6, %p878_p5 }
  0x5c   : > { %888 = shalt.err (!%p885_p10)
}
  0x5d   : > { %753 = dma.hbm_to_vmem [thread:$0]  (!%p1137_p11), %s1133_s8, 128, %s1135_s10, %s209_s28  }
  0x5e   : > { %228 = sbr.rel (%p1040_p8) target bundleno = 583 (0x247), region = 40  ;;  %s1169_s12 = sand.u32 (!%p1040_p8), 1, %s951_s19  }
  0x5f   : > { %s569_s13 = sshll.u32 (!%p1040_p8), %s1169_s12, 3  ;;  %s231_s29 = scalar_lea.sflag (!%p1040_p8), [#allocation3], %s1169_s12 }
  0x60   : > { %s1175_s17 = scalar_lea.vmem (!%p1040_p8), [#allocation2], %s569_s13  ;;  %p1274_p4 = scmp.ne.s32.totalorder (!%p1040_p8), %s1267_s24, 0 }
  0x65   : > { %934 = dma.done.wait (%p1274_p4), %s231_s29, 128  }
  0x66   : > { %936 = vsyncadd (%p1274_p4), %s231_s29, 4294967168  ;;  %p1275_p5 = scmp.eq.s32.totalorder %s1021_s22, 0 }
  0x68   : > { %938 = dma.done.wait (%p1275_p5), [#allocation6], 4096   ;;  %p1276_p8 = pmov %p1275_p5 }
  0x69   : > { %v966_v0 = vmov 0.0|0.0   ;;  %vm967_vm0 = vmmov 0   ;;  %v968_v1 = vmov 0.0   ;;  %v270_v2 = vld [vmem:[#allocation5] sm:$0xff]  ;;  %v271_v3 = vld [vmem:[#allocation5 + $0x8] sm:$0xff]  ;;  %v272_v4 = vld [vmem:[#allocation5 + $0x10] sm:$0xff] }
  0x6a   : > { %940 = vsyncadd (%p1276_p8), [#allocation6], 4294963200  ;;  %683 = vmatprep.subr.bf16.mxu0 %v966_v0  ;;  %645 = vmatprep.mubr.msk.f32.mxu0 %vm967_vm0, %v968_v1  ;;  %v684_v5 = vpack.c.bf16 %v271_v3, %v270_v2  ;;  %v273_v6 = vld [vmem:[#allocation5 + $0x18] sm:$0xff]  ;;  %v274_v8 = vld [vmem:[#allocation5 + $0x20] sm:$0xff]  ;;  %s576_s11 = sshll.u32 %s1021_s22, 7  ;;  %s268_s28 = scalar_lea.vmem [#allocation8], %s569_s13 }
  0x6b   : > { %707 = vmatprep.subr.bf16.mxu1 %v966_v0  ;;  %680 = vmatprep.mubr.msk.f32.mxu1 %vm967_vm0, %v968_v1  ;;  %v687_v7 = vpack.c.bf16 %v273_v6, %v272_v4  ;;  %v275_v9 = vld [vmem:[#allocation5 + $0x28] sm:$0xff]  ;;  %v364_v10 = vld [vmem:[#allocation7] sm:$0xff]  ;;  %v366_v12 = vld [vmem:[#allocation7 + $0x10] sm:$0xff]  ;;  %s472_s7 = sshll.u32 %s268_s28, 4  ;;  %s1214_s15 = scalar_lea.hbm %s1263_s5, %s576_s11  ;;  %s1216_s7 = int_to_ptr.vmem [resolvable:$true] %s472_s7 }
  0x6c   : > { %685 = vmatpush3.bf16.msra.mxu0 %v684_v5  ;;  %v365_v11 = vld [vmem:[#allocation7 + $0x8] sm:$0xff]  ;;  %v367_v13 = vld [vmem:[#allocation7 + $0x18] sm:$0xff]  ;;  %v690_v14 = vpack.c.bf16 %v275_v9, %v274_v8  ;;  %v276_v16 = vld [vmem:[#allocation5 + $0x30] sm:$0xff]  ;;  %s459_s16 = scalar_lea.sflag [#allocation4], %s1169_s12  ;;  %s889_s9 = scalar_lea.vmem %s1216_s7, 128 }
  0x6d   : > { %686 = vmatprep.subr.bf16.mxu0 %v966_v0  ;;  %v708_v15 = vpack.c.bf16 %v365_v11, %v364_v10  ;;  %v277_v17 = vld [vmem:[#allocation5 + $0x38] sm:$0xff]  ;;  %v711_v18 = vpack.c.bf16 %v367_v13, %v366_v12  ;;  %v368_v19 = vld [vmem:[#allocation7 + $0x20] sm:$0xff]  ;;  %v369_v20 = vld [vmem:[#allocation7 + $0x28] sm:$0xff]  ;;  %p890_p11 = scmp.ne.s32.totalorder %s1216_s7, %s889_s9  ;;  %p1277_p0 = scmp.ne.s32.totalorder %s1272_s23, 0 }
  0x6e   : > { %v693_v21 = vpack.c.bf16 %v277_v17, %v276_v16  ;;  %v278_v22 = vld [vmem:[#allocation5 + $0x40] sm:$0xff]  ;;  %v279_v23 = vld [vmem:[#allocation5 + $0x48] sm:$0xff]  ;;  %v714_v24 = vpack.c.bf16 %v369_v20, %v368_v19  ;;  %v370_v25 = vld [vmem:[#allocation7 + $0x30] sm:$0xff]  ;;  %s969_s22 = smov [#allocation8]  }
  0x6f   : > { %709 = vmatpush3.bf16.msra.mxu1 %v708_v15  ;;  %v371_v26 = vld [vmem:[#allocation7 + $0x38] sm:$0xff]  ;;  %v696_v27 = vpack.c.bf16 %v279_v23, %v278_v22  ;;  %v280_v28 = vld [vmem:[#allocation5 + $0x50] sm:$0xff]  ;;  %v372_v31 = vld [vmem:[#allocation7 + $0x40] sm:$0xff]  ;;  %p891_p1 = pnand %p890_p11, %p1277_p0  ;;  %s893_s13 = sshll.u32 %s969_s22, 4  ;;  %s894_s13 = int_to_ptr.vmem [resolvable:$false] %s893_s13 }
  0x70   : > { %688 = vmatpush3.bf16.msra.mxu0 %v687_v7  ;;  %710 = vmatprep.subr.bf16.mxu1 %v966_v0  ;;  %v281_v29 = vld [vmem:[#allocation5 + $0x58] sm:$0xff]  ;;  %v717_v30 = vpack.c.bf16 %v371_v26, %v370_v25  ;;  %v373_v32 = vld [vmem:[#allocation7 + $0x48] sm:$0xff]  ;;  %v282_v34 = vld [vmem:[#allocation5 + $0x60] sm:$0xff]  ;;  %s895_s29 = scalar_lea.vmem %s894_s13, 256  ;;  %p896_p7 = scmp.lt.s32.totalorder %s1216_s7, %s894_s13 }
  0x71   : > { %689 = vmatprep.subr.bf16.mxu0 %v966_v0  ;;  %v699_v33 = vpack.c.bf16 %v281_v29, %v280_v28  ;;  %v283_v35 = vld [vmem:[#allocation5 + $0x68] sm:$0xff]  ;;  %v720_v36 = vpack.c.bf16 %v373_v32, %v372_v31  ;;  %v374_v37 = vld [vmem:[#allocation7 + $0x50] sm:$0xff]  ;;  %v375_v38 = vld [vmem:[#allocation7 + $0x58] sm:$0xff]  ;;  %p892_p3 = pneg %p891_p1  ;;  %p897_p9 = scmp.lt.s32.totalorder %s895_s29, %s889_s9 }
  0x72   : > { %v702_v39 = vpack.c.bf16 %v283_v35, %v282_v34  ;;  %v284_v40 = vld [vmem:[#allocation5 + $0x70] sm:$0xff]  ;;  %v285_v41 = vld [vmem:[#allocation5 + $0x78] sm:$0xff]  ;;  %v723_v42 = vpack.c.bf16 %v375_v38, %v374_v37  ;;  %v376_v43 = vld [vmem:[#allocation7 + $0x60] sm:$0xff] }
  0x73   : > { %712 = vmatpush3.bf16.msra.mxu1 %v711_v18  ;;  %v377_v44 = vld [vmem:[#allocation7 + $0x68] sm:$0xff]  ;;  %v705_v45 = vpack.c.bf16 %v285_v41, %v284_v40  ;;  %v269_v47 = vld [vmem:[%s1175_s17] sm:$0xff]  ;;  %p898_p12 = por %p897_p9, %p896_p7 }
  0x74   : > { %691 = vmatpush3.bf16.msra.mxu0 %v690_v14  ;;  %713 = vmatprep.subr.bf16.mxu1 %v966_v0  ;;  %v726_v46 = vpack.c.bf16 %v377_v44, %v376_v43  ;;  %v378_v48 = vld [vmem:[#allocation7 + $0x70] sm:$0xff]  ;;  %v379_v49 = vld [vmem:[#allocation7 + $0x78] sm:$0xff] }
  0x75   : > { %692 = vmatprep.subr.bf16.mxu0 %v966_v0  ;;  %v729_v50 = vpack.c.bf16 %v379_v49, %v378_v48  ;;  %v573_v51 = vld [vmem:[%s1260_s2] ss:$0 sm:$0xff]  ;;  %p899_p2 = pnand %p898_p12, %p892_p3 }
  0x76   : > { %v574_v56 = vld [vmem:[%s1262_s4] ss:$0 sm:$0xff] }
  0x77   : > { %715 = vmatpush3.bf16.msra.mxu1 %v714_v24 }
  0x78   : > { %694 = vmatpush3.bf16.msra.mxu0 %v693_v21  ;;  %716 = vmatprep.subr.bf16.mxu1 %v966_v0 }
  0x79   : > { %695 = vmatprep.subr.bf16.mxu0 %v966_v0 }
  0x7b   : > { %718 = vmatpush3.bf16.msra.mxu1 %v717_v30 }
  0x7c   : > { %697 = vmatpush3.bf16.msra.mxu0 %v696_v27  ;;  %719 = vmatprep.subr.bf16.mxu1 %v966_v0 }
  0x7d   : > { %698 = vmatprep.subr.bf16.mxu0 %v966_v0 }
  0x7f   : > { %721 = vmatpush3.bf16.msra.mxu1 %v720_v36 }
  0x80   : > { %700 = vmatpush3.bf16.msra.mxu0 %v699_v33  ;;  %722 = vmatprep.subr.bf16.mxu1 %v966_v0 }
  0x81   : > { %701 = vmatprep.subr.bf16.mxu0 %v966_v0 }
  0x83   : > { %724 = vmatpush3.bf16.msra.mxu1 %v723_v42 }
  0x84   : > { %703 = vmatpush3.bf16.msra.mxu0 %v702_v39  ;;  %725 = vmatprep.subr.bf16.mxu1 %v966_v0 }
  0x85   : > { %704 = vmatprep.subr.bf16.mxu0 %v966_v0 }
  0x87   : > { %727 = vmatpush3.bf16.msra.mxu1 %v726_v46 }
  0x88   : > { %706 = vmatpush3.bf16.msra.mxu0 %v705_v45  ;;  %728 = vmatprep.subr.bf16.mxu1 %v966_v0 }
  0x8b   : > { %646 = vmatmul.mubr.f32.vlgmr.msra.gmra.mrb[0].mxu0 %v269_v47  ;;  %730 = vmatpush3.bf16.msra.mxu1 %v729_v50 }
 0x15e   : > { %v359_v52 = vpop.f32.mrb[0].mxu0 }
 0x15f   : > { %v360_v53 = vadd.f32 %v573_v51, %v359_v52  ;;  %v647_v54 = vpop.f32.mrb[1].mxu0 }
 0x161   : > { %v363_v55 = vmax.f32 %v360_v53, 0.0 }
 0x163   : > { %681 = vmatmul.mubr.f32.vlgmr.msra.gmra.mrb[0].mxu1 %v363_v55 }
 0x236   : > { %v453_v57 = vpop.f32.mrb[0].mxu1 }
 0x237   : > { %v454_v58 = vadd.f32 %v574_v56, %v453_v57  ;;  %v682_v59 = vpop.f32.mrb[1].mxu1 }
 0x239   : > { %457 = vst [vmem:[%s268_s28] sm:$0xff] %v454_v58 }
 0x23a   : > { %902 = shalt.err (!%p899_p2)
}
 0x23b   : > { %s903_s12 = scalar_lea.hbm %s1214_s15, 128  ;;  %s907_s26 = scalar_lea.hbm %s1263_s5, 256 }
 0x23c   : > { %p904_p13 = scmp.ne.s32.totalorder %s1214_s15, %s903_s12  ;;  %p908_p4 = scmp.lt.u32.totalorder %s1214_s15, %s1263_s5 }
 0x23d   : > { %p909_p5 = scmp.lt.u32.totalorder %s907_s26, %s903_s12  ;;  %p911_p11 = scmp.lt.u32.totalorder %s903_s12, %s1214_s15 }
 0x23e   : > { %p905_p6 = pnand %p904_p13, %p1277_p0 }
 0x23f   : > { %p910_p8 = por %p909_p5, %p908_p4 }
 0x240   : > { %p906_p10 = pneg %p905_p6 }
 0x241   : > { %p912_p1 = por %p911_p11, %p910_p8 }
 0x243   : > { %p913_p3 = pnand %p912_p1, %p906_p10 }
 0x245   : > { %916 = shalt.err (!%p913_p3)
}
 0x246   : > { %741 = dma.vmem_to_hbm [thread:$0]  (%p1277_p0), %s1216_s7, 128, %s1214_s15, %s459_s16  }
 0x247 PF: > { %s484_s11 = sand.u32 1, %s947_s18   ;;  %p1278_p7 = scmp.ne.s32.totalorder %s1268_s25, 0 }
 0x248   : > { %p1279_p9 = scmp.ge.s32.totalorder %s959_s21, 2  ;;  %s485_s28 = scalar_lea.sflag [#allocation4], %s484_s11 }
 0x24a   : > { %p755_p12 = pnand %p1279_p9, %p1278_p7 }
 0x24c   : > { %942 = dma.done.wait (!%p755_p12), %s485_s28, 128  }
 0x24d   : > { %944 = vsyncadd (!%p755_p12), %s485_s28, 4294967168  ;;  %p19_p2 = scmp.ge.s32.totalorder %s1110_s14, 4   ;;  %s1280_s18 = smov %s951_s19 }
 0x24e   : > { %s1281_s19 = smov %s955_s20  ;;  %s1282_s20 = smov %s1126_s27 }
 0x24f   : > { %s1283_s21 = smov %s1110_s14  ;;  %21 = sbr.rel (!%p19_p2) target bundleno = 6 (0x6), region = 93 }
 0x256   :  { %490 = vsyncpa [#allocation3], 1 }
 0x257   :  { %492 = vsyncpa [#allocation3 + $0x1], 1 }
 0x258   :  { %493 = vsyncpa [#allocation6], 1 }
 0x259   :  { %494 = vsyncpa [#allocation4], 1 }
 0x25a   :  { %496 = vsyncpa [#allocation4 + $0x1], 1 }

</bundles_post_ra>
